<compile_context>
chip_gen: v7x
topology: tpu7x:2x2x1
jax: 0.10.0
libtpu: 0.0.40
codegen_flags: <defaults>
</compile_context>

<pallas_src>
import math

import jax
import jax.numpy as jnp
from jax.experimental import pallas as pl
from jax.experimental.pallas import tpu as pltpu


def _round_up(x, m):
    return ((x + m - 1) // m) * m


def bow_encoder_kernel(x_ref, w1_ref, b1_ref, w2_ref, b2_ref, o_ref, acc_ref):
    """Grid = (batch_tiles, k_tiles); K is the innermost (reduction) axis."""
    k = pl.program_id(1)

    @pl.when(k == 0)
    def _():
        acc_ref[...] = jnp.zeros_like(acc_ref)

    # Inner loop: pure MXU accumulate of the first matmul over K tiles.
    x = x_ref[...].astype(w1_ref.dtype)
    acc_ref[...] += jnp.dot(x, w1_ref[...], preferred_element_type=jnp.float32)

    # Finalize once per batch tile: bias + ReLU + second matmul + bias + ReLU.
    @pl.when(k == pl.num_programs(1) - 1)
    def _():
        h = jnp.maximum(acc_ref[...] + b1_ref[...], 0.0)
        y = jnp.dot(h.astype(w2_ref.dtype), w2_ref[...],
                    preferred_element_type=jnp.float32) + b2_ref[...]
        o_ref[...] = jnp.maximum(y, 0.0).astype(o_ref.dtype)


def bow_encoder(x_bow, w1, b1, w2, b2, *, tile_b=256, tile_k=512, out_dtype=None):
    """x_bow: (B, num_words); w1: (num_words, hid); w2: (hid, hid);
    b1/b2: (1, hid).  Returns (B, hid)."""
    B, K = x_bow.shape
    Kw, hid = w1.shape
    assert Kw == K, "w1 must be stored transposed: (num_words, hid)"
    out_dtype = x_bow.dtype if out_dtype is None else out_dtype

    # Clamp tiles to the (padded) problem, keeping sublane/lane alignment.
    tile_b = min(tile_b, _round_up(B, 8))
    tile_k = min(tile_k, _round_up(K, 128))
    assert tile_b % 8 == 0, "tile_b must be a multiple of 8 (f32 sublane)"
    assert tile_k % 128 == 0, "tile_k must be a multiple of 128 (lane width)"

    B_pad = _round_up(B, tile_b)
    K_pad = _round_up(K, tile_k)
    if B_pad != B or K_pad != K:
        x_bow = jnp.pad(x_bow, ((0, B_pad - B), (0, K_pad - K)))
    if K_pad != K:
        w1 = jnp.pad(w1, ((0, K_pad - K), (0, 0)))  # zero rows: no contribution

    grid = (B_pad // tile_b, K_pad // tile_k)  # reduction axis last

    # Constant-index operands: single-buffered (no need for a 2nd buffer).
    resident = dict(pipeline_mode=pl.Buffered(1))

    out = pl.pallas_call(
        bow_encoder_kernel,
        out_shape=jax.ShapeDtypeStruct((B_pad, hid), out_dtype),
        grid_spec=pltpu.PrefetchScalarGridSpec(
            num_scalar_prefetch=0,
            grid=grid,
            in_specs=[
                pl.BlockSpec((tile_b, tile_k), lambda i, k: (i, k)),        # x tile (streamed)
                pl.BlockSpec((tile_k, hid), lambda i, k: (k, 0)),           # W1 K-slab (streamed)
                pl.BlockSpec((1, hid), lambda i, k: (0, 0), **resident),    # b1 (resident)
                pl.BlockSpec((hid, hid), lambda i, k: (0, 0), **resident),  # W2 (resident)
                pl.BlockSpec((1, hid), lambda i, k: (0, 0), **resident),    # b2 (resident)
            ],
            out_specs=pl.BlockSpec((tile_b, hid), lambda i, k: (i, 0)),
            scratch_shapes=[pltpu.VMEM((tile_b, hid), jnp.float32)],        # accumulator
        ),
        compiler_params=pltpu.CompilerParams(
            dimension_semantics=("parallel", "arbitrary"),
            vmem_limit_bytes=64 * 1024 * 1024,
        ),
    )(x_bow, w1, b1, w2, b2)

    return out[:B] if B_pad != B else out


def init_params(key, num_words, bow_mid_hid, dtype=jnp.float32):
    """Shapes/init matching the PyTorch module (weights stored transposed).
    kaiming_normal_ (fan_in) -> std = sqrt(2/fan_in); biases: PyTorch Linear
    default uniform(-1/sqrt(fan_in), 1/sqrt(fan_in))."""
    k1, k2, k3, k4 = jax.random.split(key, 4)
    std1 = math.sqrt(2.0 / num_words)
    std2 = math.sqrt(2.0 / bow_mid_hid)
    w1 = (jax.random.normal(k1, (num_words, bow_mid_hid)) * std1).astype(dtype)
    w2 = (jax.random.normal(k2, (bow_mid_hid, bow_mid_hid)) * std2).astype(dtype)
    bnd1 = 1.0 / math.sqrt(num_words)
    bnd2 = 1.0 / math.sqrt(bow_mid_hid)
    b1 = jax.random.uniform(k3, (1, bow_mid_hid), minval=-bnd1, maxval=bnd1).astype(dtype)
    b2 = jax.random.uniform(k4, (1, bow_mid_hid), minval=-bnd2, maxval=bnd2).astype(dtype)
    return w1, b1, w2, b2


def bow_encoder_ref(x, w1, b1, w2, b2):
    h = jnp.maximum(x @ w1 + b1, 0.0)
    return jnp.maximum(h @ w2 + b2, 0.0)


if __name__ == "__main__":
    # Small demo shapes; tile_b/tile_k chosen small here so the (batch, K) grid,
    # K-accumulation and padding paths are actually exercised:
    #   B=24 -> padded to 32 (2 batch tiles of 16), num_words=1000 -> padded to
    #   1024 (4 K tiles of 256).
    B, num_words, bow_mid_hid = 24, 1000, 128

    key = jax.random.PRNGKey(0)
    kx, kp = jax.random.split(key)
    x_bow = jax.random.uniform(kx, (B, num_words), dtype=jnp.float32)
    w1, b1, w2, b2 = init_params(kp, num_words, bow_mid_hid)

    out = bow_encoder(x_bow, w1, b1, w2, b2, tile_b=16, tile_k=256)
    out = jax.block_until_ready(out)

    ref = bow_encoder_ref(x_bow, w1, b1, w2, b2)
    assert out.shape == (B, bow_mid_hid)
    assert jnp.allclose(out, ref, atol=1e-4, rtol=1e-4), float(jnp.max(jnp.abs(out - ref)))

    print("KERNEL_OK")
</pallas_src>

<mosaic_0001>
module attributes {stable_mosaic.version = 11 : i64} {
  func.func @bow_encoder_kernel(%arg0: i32, %arg1: i32, %arg2: memref<16x256xf32, #tpu.memory_space<vmem>>, %arg3: memref<256x128xf32, #tpu.memory_space<vmem>>, %arg4: memref<1x128xf32, #tpu.memory_space<vmem>>, %arg5: memref<128x128xf32, #tpu.memory_space<vmem>>, %arg6: memref<1x128xf32, #tpu.memory_space<vmem>>, %arg7: memref<16x128xf32, #tpu.memory_space<vmem>>, %arg8: memref<16x128xf32, #tpu.memory_space<vmem>>) attributes {dimension_semantics = [#tpu.dimension_semantics<parallel>, #tpu.dimension_semantics<arbitrary>], iteration_bounds = array<i64: 2, 4>, scalar_prefetch = 0 : i64, scratch_operands = 1 : i64, tpu.core_type = #tpu.core_type<tc>, window_params = [{transform_indices = @transform_0, window_bounds = array<i64: 16, 256>}, {transform_indices = @transform_1, window_bounds = array<i64: 256, 128>}, {pipeline_mode = #tpu.pipeline_mode<synchronous>, transform_indices = @transform_2, window_bounds = array<i64: 1, 128>}, {pipeline_mode = #tpu.pipeline_mode<synchronous>, transform_indices = @transform_3, window_bounds = array<i64: 128, 128>}, {pipeline_mode = #tpu.pipeline_mode<synchronous>, transform_indices = @transform_4, window_bounds = array<i64: 1, 128>}, {transform_indices = @transform_5, window_bounds = array<i64: 16, 128>}]} {
    %c0_i32 = arith.constant 0 : i32
    %0 = arith.cmpi eq, %arg1, %c0_i32 : i32
    %1 = arith.extui %0 : i1 to i32
    %c0_i32_0 = arith.constant 0 : i32
    %2 = arith.cmpi ne, %1, %c0_i32_0 : i32
    scf.if %2 {
      %cst_9 = arith.constant 0.000000e+00 : f32
      %12 = vector.broadcast %cst_9 : f32 to vector<16x128xf32>
      %c0_10 = arith.constant 0 : index
      %c0_11 = arith.constant 0 : index
      %13 = vector.load %arg8[%c0_10, %c0_11] : memref<16x128xf32, #tpu.memory_space<vmem>>, vector<16x128xf32>
      tpu.vector_store %arg8[%c0_10, %c0_11], %12 {strides = array<i32>} : memref<16x128xf32, #tpu.memory_space<vmem>>, vector<16x128xf32>,
    } else {
    }
    %c0 = arith.constant 0 : index
    %c0_1 = arith.constant 0 : index
    %3 = vector.load %arg2[%c0, %c0_1] : memref<16x256xf32, #tpu.memory_space<vmem>>, vector<16x256xf32>
    %c0_2 = arith.constant 0 : index
    %c0_3 = arith.constant 0 : index
    %4 = vector.load %arg8[%c0_2, %c0_3] : memref<16x128xf32, #tpu.memory_space<vmem>>, vector<16x128xf32>
    %c0_4 = arith.constant 0 : index
    %c0_5 = arith.constant 0 : index
    %5 = vector.load %arg3[%c0_4, %c0_5] : memref<256x128xf32, #tpu.memory_space<vmem>>, vector<256x128xf32>
    %cst = arith.constant dense<0.000000e+00> : vector<16x128xf32>
    %6 = tpu.matmul %3, %5, %cst {dimension_numbers = #tpu.dot_dimension_numbers<[1], [0], [0], [1], [0, 0, 1, 1], [], []>} : vector<16x256xf32>, vector<256x128xf32>, vector<16x128xf32> -> vector<16x128xf32>
    %7 = arith.addf %4, %6 : vector<16x128xf32>
    %c0_6 = arith.constant 0 : index
    %c0_7 = arith.constant 0 : index
    %8 = vector.load %arg8[%c0_6, %c0_7] : memref<16x128xf32, #tpu.memory_space<vmem>>, vector<16x128xf32>
    tpu.vector_store %arg8[%c0_6, %c0_7], %7 {strides = array<i32>} : memref<16x128xf32, #tpu.memory_space<vmem>>, vector<16x128xf32>,
    %c3_i32 = arith.constant 3 : i32
    %9 = arith.cmpi eq, %arg1, %c3_i32 : i32
    %10 = arith.extui %9 : i1 to i32
    %c0_i32_8 = arith.constant 0 : i32
    %11 = arith.cmpi ne, %10, %c0_i32_8 : i32
    scf.if %11 {
      %c0_9 = arith.constant 0 : index
      %c0_10 = arith.constant 0 : index
      %12 = vector.load %arg8[%c0_9, %c0_10] : memref<16x128xf32, #tpu.memory_space<vmem>>, vector<16x128xf32>
      %c0_11 = arith.constant 0 : index
      %c0_12 = arith.constant 0 : index
      %13 = vector.load %arg4[%c0_11, %c0_12] : memref<1x128xf32, #tpu.memory_space<vmem>>, vector<1x128xf32>
      %14 = vector.broadcast %13 : vector<1x128xf32> to vector<16x128xf32>
      %15 = arith.addf %12, %14 : vector<16x128xf32>
      %cst_13 = arith.constant 0.000000e+00 : f32
      %16 = vector.broadcast %cst_13 : f32 to vector<16x128xf32>
      %17 = arith.maximumf %15, %16 : vector<16x128xf32>
      %c0_14 = arith.constant 0 : index
      %c0_15 = arith.constant 0 : index
      %18 = vector.load %arg5[%c0_14, %c0_15] : memref<128x128xf32, #tpu.memory_space<vmem>>, vector<128x128xf32>
      %cst_16 = arith.constant dense<0.000000e+00> : vector<16x128xf32>
      %19 = tpu.matmul %17, %18, %cst_16 {dimension_numbers = #tpu.dot_dimension_numbers<[1], [0], [0], [1], [0, 0, 1, 1], [], []>} : vector<16x128xf32>, vector<128x128xf32>, vector<16x128xf32> -> vector<16x128xf32>
      %c0_17 = arith.constant 0 : index
      %c0_18 = arith.constant 0 : index
      %20 = vector.load %arg6[%c0_17, %c0_18] : memref<1x128xf32, #tpu.memory_space<vmem>>, vector<1x128xf32>
      %21 = vector.broadcast %20 : vector<1x128xf32> to vector<16x128xf32>
      %22 = arith.addf %19, %21 : vector<16x128xf32>
      %cst_19 = arith.constant 0.000000e+00 : f32
      %23 = vector.broadcast %cst_19 : f32 to vector<16x128xf32>
      %24 = arith.maximumf %22, %23 : vector<16x128xf32>
      %c0_20 = arith.constant 0 : index
      %c0_21 = arith.constant 0 : index
      %25 = vector.load %arg7[%c0_20, %c0_21] : memref<16x128xf32, #tpu.memory_space<vmem>>, vector<16x128xf32>
      tpu.vector_store %arg7[%c0_20, %c0_21], %24 {strides = array<i32>} : memref<16x128xf32, #tpu.memory_space<vmem>>, vector<16x128xf32>,
    } else {
    }
    return
  }
  func.func @transform_0(%arg0: i32, %arg1: i32) -> (i32, i32) {
    %c0_i32 = arith.constant 0 : i32
    return %arg0, %arg1 : i32, i32
  }
  func.func @transform_1(%arg0: i32, %arg1: i32) -> (i32, i32) {
    %c0_i32 = arith.constant 0 : i32
    %c0_i32_0 = arith.constant 0 : i32
    return %arg1, %c0_i32 : i32, i32
  }
  func.func @transform_2(%arg0: i32, %arg1: i32) -> (i32, i32) {
    %c0_i32 = arith.constant 0 : i32
    %c0_i32_0 = arith.constant 0 : i32
    %c0_i32_1 = arith.constant 0 : i32
    return %c0_i32, %c0_i32_0 : i32, i32
  }
  func.func @transform_3(%arg0: i32, %arg1: i32) -> (i32, i32) {
    %c0_i32 = arith.constant 0 : i32
    %c0_i32_0 = arith.constant 0 : i32
    %c0_i32_1 = arith.constant 0 : i32
    return %c0_i32, %c0_i32_0 : i32, i32
  }
  func.func @transform_4(%arg0: i32, %arg1: i32) -> (i32, i32) {
    %c0_i32 = arith.constant 0 : i32
    %c0_i32_0 = arith.constant 0 : i32
    %c0_i32_1 = arith.constant 0 : i32
    return %c0_i32, %c0_i32_0 : i32, i32
  }
  func.func @transform_5(%arg0: i32, %arg1: i32) -> (i32, i32) {
    %c0_i32 = arith.constant 0 : i32
    %c0_i32_0 = arith.constant 0 : i32
    return %arg0, %c0_i32 : i32, i32
  }
}

</mosaic_0001>

<bundles_post_ra>
// kernel: tpu_custom_call.1
= control target key start
LH: loop header
LB: loop body
LE: loop exit
PB: predicated region body
PF: predicated region fallthrough
CT: control target
= control target key end

     0   :  { %s1940_s0 = inlined_call_operand.hbm [shape: f32[32,1024], index: 0, kind: input, shape index: {}]   ;;  %s1941_s1 = inlined_call_operand.hbm [shape: f32[1024,128], index: 1, kind: input, shape index: {}]   ;;  %s1942_s2 = inlined_call_operand.hbm [shape: f32[1,128], index: 2, kind: input, shape index: {}]   ;;  %s1943_s3 = inlined_call_operand.hbm [shape: f32[128,128], index: 3, kind: input, shape index: {}]   ;;  %s1944_s4 = inlined_call_operand.hbm [shape: f32[1,128], index: 4, kind: input, shape index: {}]   ;;  %s1945_s5 = inlined_call_operand.hbm [shape: f32[32,128], index: 5, kind: output, shape index: {}]  }
   0x1   :  { %1968 = sst [smem:[#allocation28_spill]] %s1942_s2 }
   0x2   :  { %1969 = sst [smem:[#allocation29_spill]] %s1943_s3 }
   0x3   :  { %1970 = sst [smem:[#allocation30_spill]] %s1944_s4 }
   0x4   :  { %1971 = sst [smem:[#allocation31_spill]] %s1945_s5 }
   0x5   :  { %10 = vsyncpa [#allocation4], 0 }
   0x6   :  { %12 = vsyncpa [#allocation4 + $0x1], 0 }
   0x7   :  { %13 = vsyncpa [#allocation7], 0 }
   0x8   :  { %15 = vsyncpa [#allocation7 + $0x1], 0 }
   0x9   :  { %16 = vsyncpa [#allocation10], 0 }
   0xa   :  { %17 = vsyncpa [#allocation5], 0 }
   0xb   :  { %19 = vsyncpa [#allocation5 + $0x1], 0  ;;  %s1460_s18 = smov 0   ;;  %s1462_s19 = smov 0  }
   0xc   :  { %s1464_s20 = smov 0   ;;  %s1466_s21 = smov 0  }
   0xd   :  { %s1468_s22 = smov 0   ;;  %s1470_s23 = smov 0  }
   0xe   :  { %s1472_s24 = smov 0   ;;  %s1474_s25 = smov 0  }
   0xf   :  { %s1476_s26 = smov 0   ;;  %s1478_s27 = smov 0  }
  0x10   :  { %s1480_s28 = smov 0   ;;  %s1482_s29 = smov 0  }
  0x11   :  { %s1484_s30 = smov 0   ;;  %s1486_s6 = smov 0  }
  0x12 LB: > { %1972 = sst [smem:[#allocation18_spill]] %s1362_s18  ;;  %s1527_s7 = sadd.s32 4294967295, %s1414_s6   ;;  %s1414_s6 = sphi %s1486_s6, %s25_s6   ;;  %s1410_s30 = sphi %s1484_s30, %s2035_s30   ;;  %s1406_s29 = sphi %s1482_s29, %s2034_s29   ;;  %s1402_s28 = sphi %s1480_s28, %s2033_s28   ;;  %s1398_s27 = sphi %s1478_s27, %s2032_s27   ;;  %s1394_s26 = sphi %s1476_s26, %s2031_s26   ;;  %s1390_s25 = sphi %s1474_s25, %s2030_s25   ;;  %s1386_s24 = sphi %s1472_s24, %s2029_s24   ;;  %s1382_s23 = sphi %s1470_s23, %s2028_s23   ;;  %s1378_s22 = sphi %s1468_s22, %s2027_s22   ;;  %s1374_s21 = sphi %s1466_s21, %s2026_s21   ;;  %s1370_s20 = sphi %s1464_s20, %s2025_s20   ;;  %s1366_s19 = sphi %s1462_s19, %s2024_s19   ;;  %s1362_s18 = sphi %s1460_s18, %s2021_s18  }
  0x13   : > { %1973 = sst [smem:[#allocation19_spill]] %s1366_s19  ;;  %s738_s8 = sadd.s32 4294967294, %s1414_s6  }
  0x14   : > { %1974 = sst [smem:[#allocation20_spill]] %s1398_s27  ;;  %p59_p0 = scmp.ne.s32.totalorder %s1390_s25, %s1386_s24 }
  0x15   : > { %1975 = sst [smem:[#allocation21_spill]] %s1402_s28  ;;  %p1951_p1 = scmp.eq.s32.totalorder %s1527_s7, 0 }
  0x16   : > { %1976 = sst [smem:[#allocation22_spill]] %s1527_s7  ;;  %p85_p2 = scmp.ne.s32.totalorder %s1378_s22, %s1374_s21 }
  0x17   : > { %p1536_p3 = por %p1951_p1, %p59_p0  ;;  %p171_p4 = scmp.ne.s32.totalorder %s1370_s20, %s1366_s19 }
  0x18   : > { %p1544_p5 = por %p85_p2, %p1951_p1  ;;  %p172_p6 = scmp.eq.s32.totalorder %s1527_s7, 7 }
  0x19   : > { %s1977_s10 = scalar_select %p1536_p3, 1, 0 }
  0x1a   : > { %s1978_s11 = scalar_select %p1544_p5, 1, 0 }
  0x1b   : > { %p177_p7 = scmp.ne.s32.totalorder %s1366_s19, %s1362_s18  ;;  %p178_p8 = scmp.eq.s32.totalorder %s738_s8, 7 }
  0x1c   : > { %1979 = sst [smem:[#allocation23_spill]] %s1978_s11  ;;  %p1551_p9 = por %p172_p6, %p171_p4 }
  0x1d   : > { %p739_p10 = scmp.ge.s32.totalorder %s1414_s6, 1  ;;  %p1556_p11 = por %p178_p8, %p177_p7 }
  0x1e   : > { %s1980_s12 = scalar_select %p1551_p9, 1, 0 }
  0x1f   : > { %s1982_s13 = scalar_select %p1556_p11, 1, 0 }
  0x20   : > { %1981 = sst [smem:[#allocation24_spill]] %s1980_s12  ;;  %p185_p12 = scmp.lt.s32.totalorder %s1414_s6, 9 }
  0x21   : > { %1983 = sst [smem:[#allocation25_spill]] %s1982_s13  ;;  %s1416_s15 = smov [#allocation8]  }
  0x22   : > { %p1561_p13 = pnand %p739_p10, %p185_p12  ;;  %s198_s16 = sshll.u32 %s1416_s15, 4  ;;  %s199_s16 = int_to_ptr.vmem [resolvable:$true] %s198_s16 }
  0x23   : > { %s1417_s17 = smov [#allocation9]   ;;  %s1418_s8 = smov [#allocation11]  }
  0x24   : > { %s1984_s14 = scalar_select %p1561_p13, 1, 0 }
  0x25   : > { %p960_p0 = pneg %p1561_p13  ;;  %s208_s21 = sshll.u32 %s1417_s17, 4  ;;  %s1573_s21 = int_to_ptr.vmem [resolvable:$true] %s208_s21 }
  0x26   : > { %s1575_s9 = sshll.u32 %s1418_s8, 4  ;;  %s1986_s2 = sld [smem:[#allocation28_spill]]  ;;  %s223_s9 = int_to_ptr.vmem [resolvable:$true] %s1575_s9 }
  0x27   : > { %p1569_p2 = pnand %p960_p0, %p1951_p1 }
  0x29   : > { %p1585_p6 = pneg %p1569_p2 }
  0x2c   : > { %s1112_s15 = scalar_lea.hbm %s1986_s2, 16 }
  0x2d   : > { %p1113_p4 = scmp.ne.s32.totalorder %s1986_s2, %s1112_s15  ;;  %p1119_p10 = scmp.lt.u32.totalorder %s1112_s15, %s1986_s2 }
  0x2f   : > { %p1115_p7 = pnand %p1585_p6, %p1113_p4 }
  0x31   : > { %p1116_p8 = pneg %p1115_p7 }
  0x33   : > { %p1121_p12 = pnand %p1119_p10, %p1116_p8 }
  0x35   : > { %1124 = shalt.err (!%p1121_p12)
}
  0x36   : > { %s1125_s18 = scalar_lea.vmem %s199_s16, 16  ;;  %s1132_s5 = scalar_lea.vmem %s199_s16, 32 }
  0x37   : > { %p1126_p0 = scmp.ne.s32.totalorder %s199_s16, %s1125_s18  ;;  %p1133_p9 = scmp.lt.s32.totalorder %s199_s16, %s199_s16 }
  0x38   : > { %p1134_p5 = scmp.lt.s32.totalorder %s1132_s5, %s1125_s18 }
  0x39   : > { %p1128_p1 = pnand %p1126_p0, %p1585_p6 }
  0x3a   : > { %p1135_p3 = por %p1134_p5, %p1133_p9 }
  0x3b   : > { %p1129_p11 = pneg %p1128_p1 }
  0x3d   : > { %p1136_p13 = pnand %p1135_p3, %p1129_p11 }
  0x3f   : > { %1139 = shalt.err (!%p1136_p13)
}
  0x40   : > { %963 = dma.hbm_to_vmem [thread:$0]  (!%p1569_p2), %s1986_s2, 16, %s199_s16, [#allocation7]  }
  0x41   : > { %s1988_s3 = sld [smem:[#allocation29_spill]] }
  0x47   : > { %s1140_s8 = scalar_lea.hbm %s1988_s3, 2048 }
  0x48   : > { %p1141_p1 = scmp.ne.s32.totalorder %s1988_s3, %s1140_s8  ;;  %p1147_p3 = scmp.lt.u32.totalorder %s1140_s8, %s1988_s3 }
  0x4a   : > { %p1143_p4 = pnand %p1141_p1, %p1585_p6 }
  0x4c   : > { %p1144_p5 = pneg %p1143_p4 }
  0x4e   : > { %p1149_p9 = pnand %p1147_p3, %p1144_p5 }
  0x50   : > { %1152 = shalt.err (!%p1149_p9)
}
  0x51   : > { %s1153_s16 = scalar_lea.vmem %s1573_s21, 2048  ;;  %p1161_p8 = scmp.lt.s32.totalorder %s1573_s21, %s1573_s21 }
  0x52   : > { %p1154_p11 = scmp.ne.s32.totalorder %s1573_s21, %s1153_s16  ;;  %p1162_p10 = scmp.lt.s32.totalorder %s1153_s16, %s1153_s16 }
  0x54   : > { %p1156_p13 = pnand %p1154_p11, %p1585_p6  ;;  %p1163_p12 = por %p1162_p10, %p1161_p8 }
  0x56   : > { %p1157_p7 = pneg %p1156_p13 }
  0x58   : > { %p1164_p0 = pnand %p1163_p12, %p1157_p7 }
  0x5a   : > { %1167 = shalt.err (!%p1164_p0)
}
  0x5b   : > { %s1958_s19 = smov 128   ;;  %s1959_s27 = smov 8  }
  0x5c   : > { %966 = dma.hbm_to_vmem [thread:$0]  (!%p1569_p2), %s1988_s3, 2048, %s1573_s21, [#allocation10], %s1958_s19, %s1958_s19, %s1959_s27  }
  0x5d   : > { %s1989_s4 = sld [smem:[#allocation30_spill]] }
  0x63   : > { %s1168_s8 = scalar_lea.hbm %s1989_s4, 16 }
  0x64   : > { %p1169_p1 = scmp.ne.s32.totalorder %s1989_s4, %s1168_s8  ;;  %p1175_p3 = scmp.lt.u32.totalorder %s1168_s8, %s1989_s4 }
  0x66   : > { %p1171_p4 = pnand %p1169_p1, %p1585_p6 }
  0x68   : > { %p1172_p5 = pneg %p1171_p4 }
  0x6a   : > { %p1177_p9 = pnand %p1175_p3, %p1172_p5 }
  0x6c   : > { %1180 = shalt.err (!%p1177_p9)
}
  0x6d   : > { %s1181_s12 = scalar_lea.vmem %s223_s9, 16  ;;  %s1188_s21 = scalar_lea.vmem %s223_s9, 32 }
  0x6e   : > { %p1182_p11 = scmp.ne.s32.totalorder %s223_s9, %s1181_s12  ;;  %p1189_p8 = scmp.lt.s32.totalorder %s223_s9, %s223_s9 }
  0x6f   : > { %p1190_p10 = scmp.lt.s32.totalorder %s1188_s21, %s1181_s12 }
  0x70   : > { %p1184_p13 = pnand %p1182_p11, %p1585_p6 }
  0x71   : > { %p1191_p12 = por %p1190_p10, %p1189_p8 }
  0x72   : > { %p1185_p7 = pneg %p1184_p13 }
  0x74   : > { %p1192_p0 = pnand %p1191_p12, %p1185_p7 }
  0x76   : > { %1195 = shalt.err (!%p1192_p0)
}
  0x77   : > { %969 = dma.hbm_to_vmem [thread:$0]  (!%p1569_p2), %s1989_s4, 16, %s223_s9, [#allocation10]  }
  0x78   : > { %s34_s2 = sadd.s32 1, %s1406_s29  ;;  %s37_s24 = sadd.s32 1, %s1410_s30 }
  0x79   : > { %p35_p6 = scmp.ge.s32.totalorder %s34_s2, 4  ;;  %s46_s17 = sadd.s32 1, %s1394_s26 }
  0x7a   : > { %p53_p1 = scmp.ne.s32.totalorder %s1394_s26, %s1390_s25  ;;  %p1967_p2 = scmp.eq.s32.totalorder %s1414_s6, 0 }
  0x7b   : > { %s2037_s2 = smov (%p35_p6, %s34_s2), 0  ;;  %s2039_s24 = smov (!%p35_p6, %s37_s24), %s1410_s30 }
  0x7c   : > { %1990 = sst [smem:[#allocation26_spill]] %s2037_s2  ;;  %s1656_s15 = ssub.s32 %s1406_s29, %s2037_s2 }
  0x7d   : > { %p39_p4 = scmp.ge.s32.totalorder %s2039_s24, 2  ;;  %p70_p5 = scmp.eq.s32.totalorder %s1656_s15, 0 }
  0x7e   : > { %p1662_p3 = por %p1967_p2, %p53_p1  ;;  %p1966_p9 = scmp.lt.s32.totalorder %s1414_s6, 8 }
  0x7f   : > { %s2041_s24 = smov (%p39_p4, %s2039_s24), 0  ;;  %s233_s8 = sand.u32 1, %s1394_s26  }
  0x80   : > { %1992 = sst [smem:[#allocation27_spill]] %s2041_s24  ;;  %s746_s18 = sshll.u32 %s1406_s29, 1 }
  0x81   : > { %s41_s5 = ssub.s32 %s1410_s30, %s2041_s24  ;;  %s744_s12 = sshll.u32 %s233_s8, 5 }
  0x82   : > { %s43_s16 = sor.u32 %s1656_s15, %s41_s5  ;;  %p159_p11 = scmp.eq.s32.totalorder %s41_s5, 0 }
  0x83   : > { %p44_p13 = scmp.eq.s32.totalorder %s43_s16, 0  ;;  %s1993_s21 = sadd.s32 1, %s1370_s20 }
  0x84   : > { %s1677_s13 = scalar_select %p159_p11, %s1370_s20, %s1993_s21  }
  0x85   : > { %s1680_s28 = scalar_select %p44_p13, %s1394_s26, %s46_s17  }
  0x86   : > { %s768_s19 = sshll.u32 %s1410_s30, 4  ;;  %s237_s3 = scalar_lea.vmem [#allocation3], %s744_s12 }
  0x87   : > { %s244_s27 = sadd.s32 %s768_s19, %s746_s18  ;;  %s247_s4 = sshll.u32 %s237_s3, 4  ;;  %s1683_s4 = int_to_ptr.vmem [resolvable:$true] %s247_s4 }
  0x88   : > { %s748_s2 = sshll.u32 %s244_s27, 7  ;;  %p1694_p7 = pnand %p1966_p9, %p1662_p3 }
  0x89   : > { %s1688_s24 = scalar_lea.hbm %s1940_s0, %s748_s2  ;;  %s1698_s3 = scalar_lea.sflag [#allocation4], %s233_s8 }
  0x8a   : > { %s1196_s19 = scalar_lea.hbm %s1688_s24, 512  ;;  %p1198_p10 = pneg %p1694_p7 }
  0x8b   : > { %p1197_p8 = scmp.ne.s32.totalorder %s1688_s24, %s1196_s19  ;;  %s1201_s27 = scalar_lea.hbm %s1940_s0, 4096 }
  0x8c   : > { %p1202_p6 = scmp.lt.u32.totalorder %s1688_s24, %s1940_s0  ;;  %p1203_p1 = scmp.lt.u32.totalorder %s1201_s27, %s1196_s19 }
  0x8d   : > { %p1199_p12 = pnand %p1198_p10, %p1197_p8  ;;  %p1205_p3 = scmp.lt.u32.totalorder %s1196_s19, %s1688_s24 }
  0x8e   : > { %p1204_p4 = por %p1203_p1, %p1202_p6 }
  0x8f   : > { %p1200_p0 = pneg %p1199_p12 }
  0x90   : > { %p1206_p11 = por %p1205_p3, %p1204_p4 }
  0x92   : > { %p1207_p13 = pnand %p1206_p11, %p1200_p0 }
  0x94   : > { %1210 = shalt.err (!%p1207_p13)
}
  0x95   : > { %s1211_s8 = scalar_lea.vmem %s1683_s4, 512  ;;  %s1421_s18 = smov [#allocation3]  }
  0x96   : > { %p1212_p8 = scmp.ne.s32.totalorder %s1683_s4, %s1211_s8  ;;  %s1216_s5 = sshll.u32 %s1421_s18, 4  ;;  %s1217_s5 = int_to_ptr.vmem [resolvable:$false] %s1216_s5 }
  0x97   : > { %s1218_s16 = scalar_lea.vmem %s1217_s5, 1024  ;;  %p1219_p2 = scmp.lt.s32.totalorder %s1683_s4, %s1217_s5 }
  0x98   : > { %p1214_p12 = pnand %p1212_p8, %p1198_p10  ;;  %p1220_p6 = scmp.lt.s32.totalorder %s1218_s16, %s1211_s8 }
  0x9a   : > { %p1215_p9 = pneg %p1214_p12  ;;  %p1221_p1 = por %p1220_p6, %p1219_p2 }
  0x9c   : > { %p1222_p4 = pnand %p1221_p1, %p1215_p9 }
  0x9e   : > { %1225 = shalt.err (!%p1222_p4)
}
  0x9f   : > { %s1422_s12 = smov 1024   ;;  %s1423_s21 = smov 256  }
  0xa0   : > { %s1424_s19 = smov 16   ;;  %s257_s7 = sand.u32 1, %s1414_s6  }
  0xa1   : > { %973 = dma.hbm_to_vmem [thread:$0]  (!%p1694_p7), %s1688_s24, 512, %s1683_s4, %s1698_s3, %s1422_s12, %s1423_s21, %s1424_s19  }
  0xa2   : > { %s72_s11 = sadd.s32 1, %s1382_s23  ;;  %p79_p2 = scmp.ne.s32.totalorder %s1382_s23, %s1378_s22 }
  0xa3   : > { %s1733_s27 = scalar_select %p70_p5, %s1382_s23, %s72_s11  }
  0xa4   : > { %p1995_p9 = scmp.eq.s32.totalorder %s1414_s6, 0  ;;  %s259_s2 = sand.u32 1, %s1382_s23  }
  0xa5   : > { %s749_s9 = sshll.u32 %s259_s2, 8  ;;  %s769_s8 = sshll.u32 %s1406_s29, 12 }
  0xa6   : > { %p81_p10 = por %p79_p2, %p1995_p9  ;;  %s1742_s16 = scalar_lea.hbm %s1941_s1, %s769_s8 }
  0xa7   : > { %s261_s4 = scalar_lea.vmem [#allocation6], %s749_s9  ;;  %p1996_p7 = scmp.lt.s32.totalorder %s1414_s6, 8 }
  0xa8   : > { %s268_s24 = sshll.u32 %s261_s4, 4  ;;  %s1752_s17 = scalar_lea.sflag [#allocation7], %s257_s7  ;;  %s1750_s24 = int_to_ptr.vmem [resolvable:$true] %s268_s24 }
  0xa9   : > { %p1746_p0 = pnand %p1996_p7, %p81_p10  ;;  %s1226_s3 = scalar_lea.hbm %s1742_s16, 4096 }
  0xaa   : > { %p1227_p5 = scmp.ne.s32.totalorder %s1742_s16, %s1226_s3  ;;  %s1231_s19 = scalar_lea.hbm %s1941_s1, 16384 }
  0xab   : > { %p1228_p3 = pneg %p1746_p0  ;;  %p1232_p8 = scmp.lt.u32.totalorder %s1742_s16, %s1941_s1 }
  0xac   : > { %p1233_p12 = scmp.lt.u32.totalorder %s1231_s19, %s1226_s3  ;;  %p1235_p1 = scmp.lt.u32.totalorder %s1226_s3, %s1742_s16 }
  0xad   : > { %p1229_p11 = pnand %p1228_p3, %p1227_p5 }
  0xae   : > { %p1234_p6 = por %p1233_p12, %p1232_p8 }
  0xaf   : > { %p1230_p13 = pneg %p1229_p11 }
  0xb0   : > { %p1236_p4 = por %p1235_p1, %p1234_p6 }
  0xb2   : > { %p1237_p2 = pnand %p1236_p4, %p1230_p13 }
  0xb4   : > { %1240 = shalt.err (!%p1237_p2)
}
  0xb5   : > { %s1241_s7 = scalar_lea.vmem %s1750_s24, 4096  ;;  %s1425_s9 = smov [#allocation6]  }
  0xb6   : > { %p1242_p9 = scmp.ne.s32.totalorder %s1750_s24, %s1241_s7  ;;  %s1246_s8 = sshll.u32 %s1425_s9, 4  ;;  %s1247_s8 = int_to_ptr.vmem [resolvable:$false] %s1246_s8 }
  0xb7   : > { %s1248_s18 = scalar_lea.vmem %s1247_s8, 8192  ;;  %p1249_p5 = scmp.lt.s32.totalorder %s1750_s24, %s1247_s8 }
  0xb8   : > { %p1244_p10 = pnand %p1242_p9, %p1228_p3  ;;  %p1250_p11 = scmp.lt.s32.totalorder %s1248_s18, %s1241_s7 }
  0xba   : > { %p1245_p7 = pneg %p1244_p10  ;;  %p1251_p8 = por %p1250_p11, %p1249_p5 }
  0xbc   : > { %p1252_p12 = pnand %p1251_p8, %p1245_p7 }
  0xbe   : > { %1255 = shalt.err (!%p1252_p12)
}
  0xbf   : > { %s1998_s5 = smov 8   ;;  %s1999_s4 = smov 128  }
  0xc0   : > { %976 = dma.hbm_to_vmem [thread:$0]  (!%p1746_p0), %s1742_s16, 4096, %s1750_s24, %s1752_s17, %s1999_s4, %s1999_s4, %s1998_s5  }
  0xc1   : > { %p2000_p3 = scmp.ne.s32.totalorder %s1984_s14, 0 }
  0xc2   : > { %s282_s3 = sand.u32 (!%p2000_p3), 1, %s1390_s25   ;;  %p2001_p13 = scmp.ne.s32.totalorder (!%p2000_p3), %s1977_s10, 0 }
  0xc3   : > { %280 = sbr.rel (%p2000_p3) target bundleno = 745 (0x2e9), region = 40  ;;  %s753_s12 = sshll.u32 (!%p2000_p3), %s282_s3, 5 }
  0xc4   : > { %s283_s21 = scalar_lea.sflag (!%p2000_p3), [#allocation4], %s282_s3  ;;  %s1786_s19 = scalar_lea.vmem (!%p2000_p3), [#allocation3], %s753_s12 }
  0xca   : > { %1341 = dma.done.wait (%p2001_p13), %s283_s21, 512  }
  0xcb   : > { %1343 = vsyncadd (%p2001_p13), %s283_s21, 4294966784  ;;  %s2002_s15 = sld [smem:[#allocation22_spill]]  ;;  %s2003_s11 = sld [smem:[#allocation23_spill]] }
  0xcc   : > { %s293_s16 = sand.u32 1, %s1378_s22  }
  0xcd   : > { %s754_s24 = sshll.u32 %s293_s16, 8 }
  0xce   : > { %s1794_s17 = scalar_lea.vmem [#allocation6], %s754_s24 }
  0xd1   : > { %s291_s2 = sand.u32 1, %s2002_s15   ;;  %p2004_p0 = scmp.ne.s32.totalorder %s2003_s11, 0 }
  0xd2   : > { %s292_s14 = scalar_lea.sflag [#allocation7], %s291_s2 }
  0xd3   : > { %1345 = dma.done.wait (%p2004_p0), %s292_s14, 4096  }
  0xd4   : > { %1347 = vsyncadd (%p2004_p0), %s292_s14, 4294963200  ;;  %p2005_p6 = scmp.eq.s32.totalorder %s2002_s15, 0 }
  0xd6   : > { %1349 = dma.done.wait (%p2005_p6), [#allocation7], 16   ;;  %p2006_p1 = pmov %p2005_p6 }
  0xd8   : > { %1351 = vsyncadd (%p2006_p1), [#allocation7], 4294967280  ;;  %p2007_p4 = pmov %p2006_p1 }
  0xd9   : > { %p2008_p2 = pmov %p2006_p1 }
  0xda   : > { %1353 = dma.done.wait (%p2007_p4), [#allocation10], 2064  }
  0xdb   : > { %1355 = vsyncadd (%p2008_p2), [#allocation10], 4294965232  ;;  %s2009_s10 = sld [smem:[#allocation19_spill]]  ;;  %s2010_s18 = sld [smem:[#allocation20_spill]] }
  0xe1   : > { %s336_s7 = sand.u32 1, %s2009_s10   ;;  %p759_p9 = scmp.ne.s32.totalorder %s2010_s18, 0 }
  0xe2   : > { %s758_s9 = sshll.u32 %s336_s7, 4  ;;  %v1426_v0 = vmov (!%p759_p9), 0.0  }
  0xe3   : > { %s1811_s8 = scalar_lea.vmem [#allocation12], %s758_s9  ;;  %346 = sbr.rel (%p759_p9) target bundleno = 234 (0xea), region = 64  ;;  %347 = vst [vmem:[#allocation2] sm:$0xff] (!%p759_p9), %v1426_v0  ;;  %348 = vst [vmem:[#allocation2 + $0x8] sm:$0xff] (!%p759_p9), %v1426_v0 }
  0xea PF: > { %v371_v1 = vld [vmem:[%s1794_s17 + $0x80] sm:$0xff]  ;;  %v372_v2 = vld [vmem:[%s1794_s17 + $0x88] sm:$0xff]  ;;  %v373_v6 = vld [vmem:[%s1794_s17 + $0x90] sm:$0xff]  ;;  %s2011_s5 = sld [smem:[#allocation20_spill]] }
  0xeb   : > { %v355_v3 = vld [vmem:[%s1794_s17] sm:$0xff]  ;;  %v862_v4 = vpack.c.bf16 %v372_v2, %v371_v1  ;;  %v356_v5 = vld [vmem:[%s1794_s17 + $0x8] sm:$0xff]  ;;  %v374_v7 = vld [vmem:[%s1794_s17 + $0x98] sm:$0xff] }
  0xec   : > { %v864_v8 = vpack.c.bf16 %v356_v5, %v355_v3  ;;  %v866_v9 = vpack.c.bf16 %v374_v7, %v373_v6  ;;  %v357_v10 = vld [vmem:[%s1794_s17 + $0x10] sm:$0xff]  ;;  %v358_v11 = vld [vmem:[%s1794_s17 + $0x18] sm:$0xff]  ;;  %v375_v12 = vld [vmem:[%s1794_s17 + $0xa0] sm:$0xff] }
  0xed   : > { %863 = vmatprep.subr.bf16.mxu0 %v862_v4  ;;  %926 = vmatprep.subr.bf16.mxu1 %v862_v4  ;;  %v376_v13 = vld [vmem:[%s1794_s17 + $0xa8] sm:$0xff]  ;;  %v868_v14 = vpack.c.bf16 %v358_v11, %v357_v10  ;;  %v359_v16 = vld [vmem:[%s1794_s17 + $0x20] sm:$0xff]  ;;  %v377_v18 = vld [vmem:[%s1794_s17 + $0xb0] sm:$0xff] }
  0xee   : > { %865 = vmatpush3.bf16.msra.mxu0 %v864_v8  ;;  %934 = vmatpush3.bf16.msra.mxu1 %v864_v8  ;;  %v870_v15 = vpack.c.bf16 %v376_v13, %v375_v12  ;;  %v360_v17 = vld [vmem:[%s1794_s17 + $0x28] sm:$0xff]  ;;  %v378_v19 = vld [vmem:[%s1794_s17 + $0xb8] sm:$0xff]  ;;  %v361_v22 = vld [vmem:[%s1794_s17 + $0x30] sm:$0xff] }
  0xef   : > { %867 = vmatprep.subr.bf16.mxu0 %v866_v9  ;;  %927 = vmatprep.subr.bf16.mxu1 %v866_v9  ;;  %v872_v20 = vpack.c.bf16 %v360_v17, %v359_v16  ;;  %v874_v21 = vpack.c.bf16 %v378_v19, %v377_v18  ;;  %v362_v23 = vld [vmem:[%s1794_s17 + $0x38] sm:$0xff]  ;;  %v379_v24 = vld [vmem:[%s1794_s17 + $0xc0] sm:$0xff]  ;;  %v380_v25 = vld [vmem:[%s1794_s17 + $0xc8] sm:$0xff] }
  0xf0   : > { %v350_v26 = vld [vmem:[%s1786_s19 + $0x8] sm:$0xff]  ;;  %v352_v27 = vld [vmem:[%s1786_s19 + $0x18] sm:$0xff]  ;;  %v876_v28 = vpack.c.bf16 %v362_v23, %v361_v22  ;;  %v878_v29 = vpack.c.bf16 %v380_v25, %v379_v24  ;;  %v363_v30 = vld [vmem:[%s1794_s17 + $0x40] sm:$0xff]  ;;  %p760_p10 = scmp.ne.s32.totalorder %s2011_s5, 3 }
  0xf1   : > { %451 = vmatprep.mubr.f32.mxu0 %v350_v26  ;;  %v364_v31 = vld [vmem:[%s1794_s17 + $0x48] sm:$0xff]  ;;  %v381_v32 = vld [vmem:[%s1794_s17 + $0xd0] sm:$0xff]  ;;  %v382_v33 = vld [vmem:[%s1794_s17 + $0xd8] sm:$0xff]  ;;  %456 = vmatprep.mubr.f32.mxu1 %v352_v27 }
  0xf2   : > { %869 = vmatpush3.bf16.msra.mxu0 %v868_v14  ;;  %935 = vmatpush3.bf16.msra.mxu1 %v868_v14  ;;  %v880_v34 = vpack.c.bf16 %v364_v31, %v363_v30  ;;  %v882_v35 = vpack.c.bf16 %v382_v33, %v381_v32  ;;  %v365_v36 = vld [vmem:[%s1794_s17 + $0x50] sm:$0xff]  ;;  %v366_v37 = vld [vmem:[%s1794_s17 + $0x58] sm:$0xff]  ;;  %v383_v38 = vld [vmem:[%s1794_s17 + $0xe0] sm:$0xff] }
  0xf3   : > { %871 = vmatprep.subr.bf16.mxu0 %v870_v15  ;;  %928 = vmatprep.subr.bf16.mxu1 %v870_v15  ;;  %v384_v39 = vld [vmem:[%s1794_s17 + $0xe8] sm:$0xff]  ;;  %v884_v40 = vpack.c.bf16 %v366_v37, %v365_v36  ;;  %v367_v42 = vld [vmem:[%s1794_s17 + $0x60] sm:$0xff]  ;;  %v385_v44 = vld [vmem:[%s1794_s17 + $0xf0] sm:$0xff] }
  0xf4   : > { %v886_v41 = vpack.c.bf16 %v384_v39, %v383_v38  ;;  %v368_v43 = vld [vmem:[%s1794_s17 + $0x68] sm:$0xff]  ;;  %v386_v45 = vld [vmem:[%s1794_s17 + $0xf8] sm:$0xff]  ;;  %v369_v48 = vld [vmem:[%s1794_s17 + $0x70] sm:$0xff] }
  0xf5   : > { %v888_v46 = vpack.c.bf16 %v368_v43, %v367_v42  ;;  %v890_v47 = vpack.c.bf16 %v386_v45, %v385_v44  ;;  %v370_v49 = vld [vmem:[%s1794_s17 + $0x78] sm:$0xff]  ;;  %v349_v51 = vld [vmem:[%s1786_s19] sm:$0xff]  ;;  %v351_v52 = vld [vmem:[%s1786_s19 + $0x10] sm:$0xff] }
  0xf6   : > { %873 = vmatpush3.bf16.msra.mxu0 %v872_v20  ;;  %936 = vmatpush3.bf16.msra.mxu1 %v872_v20  ;;  %v892_v50 = vpack.c.bf16 %v370_v49, %v369_v48  ;;  %v353_v55 = vld [vmem:[#allocation2] sm:$0xff]  ;;  %v354_v57 = vld [vmem:[#allocation2 + $0x8] sm:$0xff]  ;;  %v483_v63 = vld [vmem:[#allocation9] sm:$0xff] (!%p760_p10) }
  0xf7   : > { %875 = vmatprep.subr.bf16.mxu0 %v874_v21  ;;  %929 = vmatprep.subr.bf16.mxu1 %v874_v21  ;;  %v484_v0 = vld [vmem:[#allocation9 + $0x8] sm:$0xff] (!%p760_p10)  ;;  %v485_v1 = vld [vmem:[#allocation9 + $0x10] sm:$0xff] (!%p760_p10)  ;;  %v486_v3 = vld [vmem:[#allocation9 + $0x18] sm:$0xff] (!%p760_p10) }
  0xf8   : > { %v894_v2 = vpack.c.bf16 (!%p760_p10), %v484_v0, %v483_v63  ;;  %v898_v4 = vpack.c.bf16 (!%p760_p10), %v486_v3, %v485_v1  ;;  %v487_v5 = vld [vmem:[#allocation9 + $0x20] sm:$0xff] (!%p760_p10)  ;;  %v488_v6 = vld [vmem:[#allocation9 + $0x28] sm:$0xff] (!%p760_p10)  ;;  %v489_v9 = vld [vmem:[#allocation9 + $0x30] sm:$0xff] (!%p760_p10) }
  0xf9   : > { %v902_v7 = vpack.c.bf16 (!%p760_p10), %v488_v6, %v487_v5  ;;  %v490_v10 = vld [vmem:[#allocation9 + $0x38] sm:$0xff] (!%p760_p10)  ;;  %v491_v15 = vld [vmem:[#allocation9 + $0x40] sm:$0xff] (!%p760_p10)  ;;  %v492_v16 = vld [vmem:[#allocation9 + $0x48] sm:$0xff] (!%p760_p10) }
  0xfa   : > { %877 = vmatpush3.bf16.msra.mxu0 %v876_v28  ;;  %937 = vmatpush3.bf16.msra.mxu1 %v876_v28  ;;  %v761_v11 = vld [vmem:[#allocation8] ss:$0 sm:$0xff] (!%p760_p10)  ;;  %v906_v13 = vpack.c.bf16 (!%p760_p10), %v490_v10, %v489_v9  ;;  %v910_v17 = vpack.c.bf16 (!%p760_p10), %v492_v16, %v491_v15  ;;  %v493_v18 = vld [vmem:[#allocation9 + $0x50] sm:$0xff] (!%p760_p10)  ;;  %v495_v21 = vld [vmem:[#allocation9 + $0x60] sm:$0xff] (!%p760_p10) }
  0xfb   : > { %879 = vmatprep.subr.bf16.mxu0 %v878_v29  ;;  %930 = vmatprep.subr.bf16.mxu1 %v878_v29  ;;  %v494_v19 = vld [vmem:[#allocation9 + $0x58] sm:$0xff] (!%p760_p10)  ;;  %v496_v22 = vld [vmem:[#allocation9 + $0x68] sm:$0xff] (!%p760_p10)  ;;  %v497_v24 = vld [vmem:[#allocation9 + $0x70] sm:$0xff] (!%p760_p10) }
  0xfc   : > { %v914_v20 = vpack.c.bf16 (!%p760_p10), %v494_v19, %v493_v18  ;;  %v918_v23 = vpack.c.bf16 (!%p760_p10), %v496_v22, %v495_v21  ;;  %v498_v25 = vld [vmem:[#allocation9 + $0x78] sm:$0xff] (!%p760_p10)  ;;  %v762_v30 = vld [vmem:[#allocation11] ss:$0 sm:$0xff] (!%p760_p10) }
  0xfd   : > { %v922_v27 = vpack.c.bf16 (!%p760_p10), %v498_v25, %v497_v24 }
  0xfe   : > { %881 = vmatpush3.bf16.msra.mxu0 %v880_v34  ;;  %938 = vmatpush3.bf16.msra.mxu1 %v880_v34 }
  0xff   : > { %883 = vmatprep.subr.bf16.mxu0 %v882_v35  ;;  %931 = vmatprep.subr.bf16.mxu1 %v882_v35 }
 0x102   : > { %885 = vmatpush3.bf16.msra.mxu0 %v884_v40  ;;  %939 = vmatpush3.bf16.msra.mxu1 %v884_v40 }
 0x103   : > { %887 = vmatprep.subr.bf16.mxu0 %v886_v41  ;;  %932 = vmatprep.subr.bf16.mxu1 %v886_v41 }
 0x106   : > { %889 = vmatpush3.bf16.msra.mxu0 %v888_v46  ;;  %940 = vmatpush3.bf16.msra.mxu1 %v888_v46 }
 0x107   : > { %891 = vmatprep.subr.bf16.mxu0 %v890_v47  ;;  %933 = vmatprep.subr.bf16.mxu1 %v890_v47 }
 0x10a   : > { %893 = vmatpush3.bf16.msra.mxu0 %v892_v50  ;;  %941 = vmatpush3.bf16.msra.mxu1 %v892_v50 }
 0x10b   : > { %895 = vmatprep.subr.bf16.mxu0 (!%p760_p10), %v894_v2 }
 0x10d   : > { %452 = vmatmul.mubr.f32.vlgmr.msra.gmra.mrb[0].mxu0 %v349_v51  ;;  %457 = vmatmul.mubr.f32.vlgmr.msra.gmra.mrb[0].mxu1 %v351_v52 }
 0x10e   : > { %897 = vmatpush3.bf16.msra.mxu0 (!%p760_p10), %v894_v2 }
 0x10f   : > { %899 = vmatprep.subr.bf16.mxu0 (!%p760_p10), %v898_v4 }
 0x112   : > { %901 = vmatpush3.bf16.msra.mxu0 (!%p760_p10), %v898_v4 }
 0x113   : > { %903 = vmatprep.subr.bf16.mxu0 (!%p760_p10), %v902_v7 }
 0x116   : > { %905 = vmatpush3.bf16.msra.mxu0 (!%p760_p10), %v902_v7 }
 0x117   : > { %907 = vmatprep.subr.bf16.mxu0 (!%p760_p10), %v906_v13 }
 0x11a   : > { %909 = vmatpush3.bf16.msra.mxu0 (!%p760_p10), %v906_v13 }
 0x11b   : > { %911 = vmatprep.subr.bf16.mxu0 (!%p760_p10), %v910_v17 }
 0x11e   : > { %913 = vmatpush3.bf16.msra.mxu0 (!%p760_p10), %v910_v17 }
 0x11f   : > { %915 = vmatprep.subr.bf16.mxu0 (!%p760_p10), %v914_v20 }
 0x122   : > { %917 = vmatpush3.bf16.msra.mxu0 (!%p760_p10), %v914_v20 }
 0x123   : > { %919 = vmatprep.subr.bf16.mxu0 (!%p760_p10), %v918_v23 }
 0x126   : > { %921 = vmatpush3.bf16.msra.mxu0 (!%p760_p10), %v918_v23 }
 0x127   : > { %923 = vmatprep.subr.bf16.mxu0 (!%p760_p10), %v922_v27 }
 0x12a   : > { %925 = vmatpush3.bf16.msra.mxu0 (!%p760_p10), %v922_v27 }
 0x1e0   : > { %v803_v53 = vpop.f32.mrb[0].mxu0  ;;  %v806_v54 = vpop.f32.mrb[0].mxu1  ;;  %469 = sbr.rel (%p760_p10) target bundleno = 717 (0x2cd), region = 68 }
 0x1e1   : > { %v804_v56 = vpop.f32.mrb[1].mxu0  ;;  %v807_v58 = vpop.f32.mrb[1].mxu1 }
 0x1e2   : > { %v805_v59 = vadd.f32 %v804_v56, %v803_v53  ;;  %v808_v60 = vadd.f32 %v807_v58, %v806_v54 }
 0x1e4   : > { %v462_v61 = vadd.f32 %v805_v59, %v353_v55  ;;  %v463_v62 = vadd.f32 %v808_v60, %v354_v57 }
 0x1e6   : > { %464 = vst [vmem:[#allocation2] sm:$0xff] %v462_v61  ;;  %465 = vst [vmem:[#allocation2 + $0x8] sm:$0xff] %v463_v62 }
 0x1ed   : > { %v470_v8 = vld [vmem:[#allocation2] sm:$0xff]  ;;  %v471_v26 = vld [vmem:[#allocation2 + $0x8] sm:$0xff] }
 0x1ee   : > { %v479_v12 = vadd.f32 %v761_v11, %v470_v8  ;;  %v480_v28 = vadd.f32 %v761_v11, %v471_v26 }
 0x1f0   : > { %v481_v14 = vmax.f32 %v479_v12, 0.0  ;;  %v482_v29 = vmax.f32 %v480_v28, 0.0 }
 0x1f2   : > { %859 = vmatprep.mubr.f32.mxu0 %v481_v14 }
 0x1f3   : > { %860 = vmatmul.mubr.f32.vlgmr.msra.gmra.mrb[0].mxu0 %v482_v29 }
 0x2c6   : > { %v861_v31 = vpop.f32.mrb[0].mxu0 }
 0x2c7   : > { %v578_v32 = vadd.f32 %v861_v31, %v762_v30  ;;  %v572_v33 = vpop.f32.mrb[1].mxu0 }
 0x2c8   : > { %v573_v34 = vadd.f32 %v762_v30, %v572_v33 }
 0x2c9   : > { %v582_v35 = vmax.f32 %v578_v32, 0.0 }
 0x2ca   : > { %v581_v36 = vmax.f32 %v573_v34, 0.0 }
 0x2cb   : > { %584 = vst [vmem:[%s1811_s8 + $0x8] sm:$0xff] %v582_v35 }
 0x2cc   : > { %583 = vst [vmem:[%s1811_s8] sm:$0xff] %v581_v36 }
 0x2cd PF: > { %s2012_s4 = sld [smem:[#allocation21_spill]]  ;;  %s2014_s12 = sld [smem:[#allocation24_spill]] }
 0x2ce   : > { %s2015_s11 = sld [smem:[#allocation31_spill]]  ;;  %s599_s16 = sshll.u32 %s1811_s8, 4  ;;  %s1860_s16 = int_to_ptr.vmem [resolvable:$true] %s599_s16 }
 0x2cf   : > { %s1864_s24 = scalar_lea.sflag [#allocation5], %s336_s7  ;;  %s1256_s14 = scalar_lea.vmem %s1860_s16, 256 }
 0x2d0   : > { %p1257_p7 = scmp.ne.s32.totalorder %s1860_s16, %s1256_s14  ;;  %s1427_s17 = smov [#allocation12]  }
 0x2d1   : > { %s1260_s10 = sshll.u32 %s1427_s17, 4  ;;  %s1261_s10 = int_to_ptr.vmem [resolvable:$false] %s1260_s10 }
 0x2d2   : > { %s1262_s9 = scalar_lea.vmem %s1261_s10, 512  ;;  %p1263_p12 = scmp.lt.s32.totalorder %s1860_s16, %s1261_s10 }
 0x2d3   : > { %s770_s21 = sshll.u32 %s2012_s4, 8  ;;  %p2016_p5 = scmp.ne.s32.totalorder %s2014_s12, 0 }
 0x2d4   : > { %s1857_s2 = scalar_lea.hbm %s2015_s11, %s770_s21  ;;  %p1264_p3 = scmp.lt.s32.totalorder %s1262_s9, %s1256_s14 }
 0x2d5   : > { %p1258_p11 = pnand %p1257_p7, %p2016_p5 }
 0x2d6   : > { %p1265_p13 = por %p1264_p3, %p1263_p12 }
 0x2d7   : > { %p1259_p8 = pneg %p1258_p11 }
 0x2d9   : > { %p1266_p0 = pnand %p1265_p13, %p1259_p8 }
 0x2db   : > { %1269 = shalt.err (!%p1266_p0)
}
 0x2dc   : > { %s1270_s7 = scalar_lea.hbm %s1857_s2, 256  ;;  %s1274_s5 = scalar_lea.hbm %s2015_s11, 512 }
 0x2dd   : > { %p1271_p6 = scmp.ne.s32.totalorder %s1857_s2, %s1270_s7  ;;  %p1275_p2 = scmp.lt.u32.totalorder %s1857_s2, %s2015_s11 }
 0x2de   : > { %p1276_p9 = scmp.lt.u32.totalorder %s1274_s5, %s1270_s7  ;;  %p1278_p7 = scmp.lt.u32.totalorder %s1270_s7, %s1857_s2 }
 0x2df   : > { %p1272_p1 = pnand %p1271_p6, %p2016_p5 }
 0x2e0   : > { %p1277_p10 = por %p1276_p9, %p1275_p2 }
 0x2e1   : > { %p1273_p4 = pneg %p1272_p1 }
 0x2e2   : > { %p1279_p11 = por %p1278_p7, %p1277_p10 }
 0x2e4   : > { %p1280_p8 = pnand %p1279_p11, %p1273_p4 }
 0x2e6   : > { %1283 = shalt.err (!%p1280_p8)
}
 0x2e7   : > { %s1428_s21 = smov 128   ;;  %s1429_s19 = smov 8  }
 0x2e8   : > { %958 = dma.vmem_to_hbm [thread:$0]  (%p2016_p5), %s1860_s16, 256, %s1857_s2, %s1864_s24, %s1428_s21, %s1428_s21, %s1429_s19  }
 0x2e9 PF: > { %s2017_s15 = sld [smem:[#allocation18_spill]]  ;;  %s2018_s14 = sld [smem:[#allocation25_spill]] }
 0x2ea   : > { %p988_p12 = scmp.ge.s32.totalorder %s1414_s6, 2 }
 0x2ef   : > { %s614_s17 = sand.u32 1, %s2017_s15   ;;  %p2019_p3 = scmp.ne.s32.totalorder %s2018_s14, 0 }
 0x2f0   : > { %s615_s10 = scalar_lea.sflag [#allocation5], %s614_s17 }
 0x2f1   : > { %p978_p13 = pnand %p988_p12, %p2019_p3 }
 0x2f3   : > { %1357 = dma.done.wait (!%p978_p13), %s615_s10, 256  }
 0x2f4   : > { %1359 = vsyncadd (!%p978_p13), %s615_s10, 4294967040  ;;  %s25_s6 = sadd.s32 1, %s1414_s6   ;;  %s2021_s18 = sld [smem:[#allocation19_spill]] }
 0x2f5   : > { %p1893_p0 = scmp.ge.s32.totalorder %s25_s6, 10   ;;  %s2022_s12 = sld [smem:[#allocation26_spill]] }
 0x2f6   : > { %s2023_s2 = sld [smem:[#allocation27_spill]]  ;;  %s2024_s19 = smov %s1370_s20 }
 0x2f7   : > { %s2025_s20 = smov %s1677_s13  ;;  %s2026_s21 = smov %s1378_s22 }
 0x2f8   : > { %s2027_s22 = smov %s1382_s23  ;;  %s2028_s23 = smov %s1733_s27 }
 0x2f9   : > { %s2029_s24 = smov %s1390_s25  ;;  %s2030_s25 = smov %s1394_s26 }
 0x2fa   : > { %s2031_s26 = smov %s1680_s28  ;;  %s2032_s27 = smov %s1406_s29 }
 0x2fb   : > { %s2033_s28 = smov %s1410_s30  ;;  %s2034_s29 = smov %s2022_s12 }
 0x2fc   : > { %s2035_s30 = smov %s2023_s2  ;;  %24 = sbr.rel (!%p1893_p0) target bundleno = 18 (0x12), region = 118 }
 0x303   :  { %620 = vsyncpa [#allocation4], 1 }
 0x304   :  { %622 = vsyncpa [#allocation4 + $0x1], 1 }
 0x305   :  { %623 = vsyncpa [#allocation7], 1 }
 0x306   :  { %625 = vsyncpa [#allocation7 + $0x1], 1 }
 0x307   :  { %626 = vsyncpa [#allocation10], 1 }
 0x308   :  { %627 = vsyncpa [#allocation5], 1 }
 0x309   :  { %629 = vsyncpa [#allocation5 + $0x1], 1 }

</bundles_post_ra>
